<compile_context>
chip_gen: v7x
topology: tpu7x:2x2x1
jax: 0.10.0
libtpu: 0.0.40
codegen_flags: <defaults>
</compile_context>

<pallas_src>
import functools

import jax
import jax.numpy as jnp
import numpy as np
from jax import lax
from jax.experimental import pallas as pl
from jax.experimental.pallas import tpu as pltpu


# ---------------------------------------------------------------------------
# Model hyper-parameters (fixed, as in the PyTorch spec)
# ---------------------------------------------------------------------------
FIELD_DIMS = np.array([10, 20], dtype=np.int64)   # [num_users, num_items]
USER_FIELD_IDX = 0
ITEM_FIELD_IDX = 1
EMBED_DIM = 32
MLP_DIMS = (64, 32)
BN_EPS = 1e-5


# ---------------------------------------------------------------------------
# Pallas kernel: fused gather+layer1 per field, layer2, fused final FC.
# All activations are (feature, TM): batch lives on the lane axis.
# ---------------------------------------------------------------------------
def ncf_kernel(idx_ref,      # (2, TM)      int32  global embedding row ids
               tabA_ref,     # (E+H1, NP)   f32    [embT * wg ; W1a^T @ embT]   (field 0 / user)
               tabB_ref,     # (E+H1, NP)   f32    [embT      ; W1b^T @ embT]   (field 1 / item)
               w2T_ref,      # (H2, H1)     f32    second Linear (BN folded), transposed
               vec_ref,      # (H1+2*H2+1,1)f32    packed [b1 ; b2 ; wm ; bfc]
               out_ref):     # (1, TM)      f32    lane-dense output
    np_pad = tabA_ref.shape[-1]
    tm = idx_ref.shape[-1]
    H2, H1 = w2T_ref.shape
    E = tabA_ref.shape[0] - H1

    idx = idx_ref[...]                                               # (2, TM)
    iota = lax.broadcasted_iota(jnp.int32, (np_pad, tm), 0)

    # Gather (and layer-1 contribution) as one-hot matmuls on the MXU:
    #   (E+H1, NP) @ (NP, TM) -> (E+H1, TM)
    oh_a = (iota == idx[0:1, :]).astype(jnp.float32)                 # field 0 (user)
    oh_b = (iota == idx[1:2, :]).astype(jnp.float32)                 # field 1 (item)
    ga = jnp.dot(tabA_ref[...], oh_a, preferred_element_type=jnp.float32)
    gb = jnp.dot(tabB_ref[...], oh_b, preferred_element_type=jnp.float32)

    # Packed small vectors (static sublane-aligned slices of the VMEM ref).
    b1 = vec_ref[0:H1, :]                                            # (H1, 1)
    b2 = vec_ref[H1:H1 + H2, :]                                      # (H2, 1)
    wm = vec_ref[H1 + H2:H1 + 2 * H2, :]                             # (H2, 1)
    bfc = vec_ref[H1 + 2 * H2:H1 + 2 * H2 + 1, :]                    # (1, 1)

    # MLP: layer-1 pre-activation already delivered by the gather matmuls.
    h1 = jnp.maximum(ga[E:, :] + gb[E:, :] + b1, 0.0)                # (H1, TM)
    h2 = jnp.maximum(
        jnp.dot(w2T_ref[...], h1, preferred_element_type=jnp.float32) + b2,
        0.0)                                                         # (H2, TM)

    # Final FC: GMF half is pre-folded into tabA (rows scaled by wg), so it is a
    # plain sublane reduce; MLP half is a VPU multiply + sublane reduce.
    out = (jnp.sum(ga[:E, :] * gb[:E, :], axis=0, keepdims=True)
           + jnp.sum(wm * h2, axis=0, keepdims=True)
           + bfc)                                                    # (1, TM)
    out_ref[...] = out.astype(out_ref.dtype)


def ncf_pallas_call(idx_T, tabA, tabB, w2T, vec, *, tm):
    F, b_pad = idx_T.shape
    assert b_pad % tm == 0 and tm % 128 == 0

    def const(shape):                                                # weights stay resident
        return pl.BlockSpec(shape, lambda i: (0, 0))

    return pl.pallas_call(
        ncf_kernel,
        out_shape=jax.ShapeDtypeStruct((1, b_pad), jnp.float32),
        grid=(b_pad // tm,),
        in_specs=[pl.BlockSpec((F, tm), lambda i: (0, i)),           # per-tile indices
                  const(tabA.shape), const(tabB.shape),
                  const(w2T.shape), const(vec.shape)],
        out_specs=pl.BlockSpec((1, tm), lambda i: (0, i)),
        compiler_params=pltpu.CompilerParams(
            dimension_semantics=("parallel",),                       # shard batch tiles across TCs
            vmem_limit_bytes=32 * 1024 * 1024),                      # safe on v5e/v6e/v7x
    )(idx_T, tabA, tabB, w2T, vec)


# ---------------------------------------------------------------------------
# Parameters (built deterministically in-script)
# ---------------------------------------------------------------------------
def init_params(key):
    num_fields = len(FIELD_DIMS)
    embed_output_dim = num_fields * EMBED_DIM
    keys = jax.random.split(key, 8)

    n_emb = int(np.sum(FIELD_DIMS))
    lim = float(np.sqrt(6.0 / (n_emb + EMBED_DIM)))
    emb = jax.random.uniform(keys[0], (n_emb, EMBED_DIM), jnp.float32, -lim, lim)

    def linear_init(kw, kb, fan_in, fan_out):
        bound = 1.0 / np.sqrt(fan_in)
        w = jax.random.uniform(kw, (fan_in, fan_out), jnp.float32, -bound, bound)
        b = jax.random.uniform(kb, (fan_out,), jnp.float32, -bound, bound)
        return w, b

    w1, b1 = linear_init(keys[1], keys[2], embed_output_dim, MLP_DIMS[0])
    w2, b2 = linear_init(keys[3], keys[4], MLP_DIMS[0], MLP_DIMS[1])
    wfc, bfc = linear_init(keys[5], keys[6], MLP_DIMS[1] + EMBED_DIM, 1)

    bn = []
    for d in MLP_DIMS:
        bn.append(dict(gamma=jnp.ones((d,), jnp.float32),
                       beta=jnp.zeros((d,), jnp.float32),
                       mean=jnp.zeros((d,), jnp.float32),
                       var=jnp.ones((d,), jnp.float32)))

    offsets = jnp.asarray(
        np.array((0, *np.cumsum(FIELD_DIMS)[:-1]), dtype=np.int32))

    return dict(emb=emb, offsets=offsets,
                w1=w1, b1=b1, w2=w2, b2=b2, wfc=wfc, bfc=bfc, bn=bn)


def fold_bn(w, b, bn):
    """Fold eval-mode BatchNorm1d into the preceding Linear layer."""
    scale = bn["gamma"] / jnp.sqrt(bn["var"] + BN_EPS)               # (H,)
    shift = bn["beta"] - bn["mean"] * scale                          # (H,)
    return w * scale[None, :], b * scale + shift


@functools.partial(jax.jit, static_argnames=("tm_max",))
def ncf_forward(x_idx, params, tm_max=4096):
    """x_idx: int32 (batch, 2) raw [user_id, item_id]. Returns float32 (batch,)."""
    B, F = x_idx.shape
    E = EMBED_DIM
    emb = params["emb"]
    n_emb = emb.shape[0]
    n_pad = ((n_emb + 7) // 8) * 8

    # --- fold BN into the Linears; transpose to feature-major -----------------
    w1f, b1f = fold_bn(params["w1"], params["b1"], params["bn"][0])
    w2f, b2f = fold_bn(params["w2"], params["b2"], params["bn"][1])
    w1aT = w1f[:E, :].T                                              # (H1, E) — user slice
    w1bT = w1f[E:2 * E, :].T                                         # (H1, E) — item slice
    w2T = w2f.T                                                      # (H2, H1)
    wfc = params["wfc"]
    wg = wfc[:E, 0]                                                  # (E,)   final-FC gmf part
    wm = wfc[E:, :]                                                  # (H2,1) final-FC mlp part
    bfc = params["bfc"].reshape(1, 1)

    # Embedding table, transposed + column-padded (padded columns never selected).
    embT = jnp.zeros((E, n_pad), jnp.float32).at[:, :n_emb].set(emb.T)

    # Fuse layer-1 into the gather tables; fold diag(wg) into field-0 rows.
    Ga = w1aT @ embT                                                 # (H1, NP)
    Gb = w1bT @ embT                                                 # (H1, NP)
    tabA = jnp.concatenate([embT * wg[:, None], Ga], axis=0)         # (E+H1, NP)
    tabB = jnp.concatenate([embT, Gb], axis=0)                       # (E+H1, NP)

    # Pack biases + remaining final-FC weight into one column operand.
    vec = jnp.concatenate([b1f.reshape(-1, 1), b2f.reshape(-1, 1), wm, bfc],
                          axis=0)                                    # (H1+2*H2+1, 1)

    # Global embedding row ids, batch on lanes; pad batch to a tile multiple
    # (padded columns gather row 0 and are discarded).
    idx_g = (x_idx + params["offsets"][None, :]).astype(jnp.int32)   # (B, F)

    # Batch-tile selection: large tiles amortize the ~0.35us per-grid-step
    # overhead; cap so the grid keeps >= 2 steps (v7x has 2 TensorCores).
    b128 = ((B + 127) // 128) * 128
    half = ((b128 // 2) // 128) * 128
    tm = min(tm_max, half) if half >= 128 else b128
    b_pad = ((B + tm - 1) // tm) * tm
    idx_T = jnp.zeros((F, b_pad), jnp.int32).at[:, :B].set(idx_g.T)

    out = ncf_pallas_call(idx_T, tabA, tabB, w2T, vec, tm=tm)
    return out[0, :B]                                                # (B,)


# ---------------------------------------------------------------------------
# Reference (pure JAX) for sanity check
# ---------------------------------------------------------------------------
def ncf_reference(x_idx, params):
    B, F = x_idx.shape
    idx = x_idx + params["offsets"][None, :]
    emb = jnp.take(params["emb"], idx, axis=0)
    user_x = emb[:, USER_FIELD_IDX]
    item_x = emb[:, ITEM_FIELD_IDX]
    gmf = user_x * item_x
    h = emb.reshape(B, F * EMBED_DIM)
    for (w, b, bn) in ((params["w1"], params["b1"], params["bn"][0]),
                       (params["w2"], params["b2"], params["bn"][1])):
        h = h @ w + b
        h = (h - bn["mean"]) / jnp.sqrt(bn["var"] + BN_EPS) * bn["gamma"] + bn["beta"]
        h = jnp.maximum(h, 0.0)
    cat = jnp.concatenate([gmf, h], axis=1)
    return (cat @ params["wfc"] + params["bfc"])[:, 0]


# ---------------------------------------------------------------------------
if __name__ == "__main__":
    key = jax.random.PRNGKey(0)
    pkey, xkey_u, xkey_i = jax.random.split(key, 3)
    params = init_params(pkey)

    B = 200                                   # -> tm=128, grid of 2 tiles (>=2 steps)
    user_ids = jax.random.randint(xkey_u, (B, 1), 0, int(FIELD_DIMS[0]), jnp.int32)
    item_ids = jax.random.randint(xkey_i, (B, 1), 0, int(FIELD_DIMS[1]), jnp.int32)
    x_idx = jnp.concatenate([user_ids, item_ids], axis=1)            # (B, 2) int32

    out = ncf_forward(x_idx, params)
    out = jax.block_until_ready(out)

    ref = ncf_reference(x_idx, params)
    np.testing.assert_allclose(np.asarray(out), np.asarray(ref),
                               rtol=1e-5, atol=1e-5)
    assert out.shape == (B,)
    print("KERNEL_OK")
</pallas_src>

<mosaic_0001>
module attributes {stable_mosaic.version = 11 : i64} {
  func.func @ncf_kernel(%arg0: i32, %arg1: memref<2x128xi32, #tpu.memory_space<vmem>>, %arg2: memref<96x32xf32, #tpu.memory_space<vmem>>, %arg3: memref<96x32xf32, #tpu.memory_space<vmem>>, %arg4: memref<32x64xf32, #tpu.memory_space<vmem>>, %arg5: memref<129x1xf32, #tpu.memory_space<vmem>>, %arg6: memref<1x128xf32, #tpu.memory_space<vmem>>) attributes {dimension_semantics = [#tpu.dimension_semantics<parallel>], iteration_bounds = array<i64: 2>, scalar_prefetch = 0 : i64, scratch_operands = 0 : i64, tpu.core_type = #tpu.core_type<tc>, window_params = [{transform_indices = @transform_0, window_bounds = array<i64: 2, 128>}, {pipeline_mode = #tpu.pipeline_mode<synchronous>, transform_indices = @transform_1, window_bounds = array<i64: 96, 32>}, {pipeline_mode = #tpu.pipeline_mode<synchronous>, transform_indices = @transform_2, window_bounds = array<i64: 96, 32>}, {pipeline_mode = #tpu.pipeline_mode<synchronous>, transform_indices = @transform_3, window_bounds = array<i64: 32, 64>}, {pipeline_mode = #tpu.pipeline_mode<synchronous>, transform_indices = @transform_4, window_bounds = array<i64: 129, 1>}, {transform_indices = @transform_5, window_bounds = array<i64: 1, 128>}]} {
    %c0 = arith.constant 0 : index
    %c0_0 = arith.constant 0 : index
    %0 = vector.load %arg1[%c0, %c0_0] : memref<2x128xi32, #tpu.memory_space<vmem>>, vector<2x128xi32>
    %1 = tpu.iota {dimensions = array<i32: 0>} : vector<32x128xi32>
    %2 = vector.extract_strided_slice %0 {offsets = [0, 0], sizes = [1, 128], strides = [1, 1]} : vector<2x128xi32> to vector<1x128xi32>
    %3 = vector.broadcast %2 : vector<1x128xi32> to vector<32x128xi32>
    %4 = arith.cmpi eq, %1, %3 : vector<32x128xi32>
    %5 = arith.extui %4 : vector<32x128xi1> to vector<32x128xi32>
    %6 = arith.sitofp %5 : vector<32x128xi32> to vector<32x128xf32>
    %7 = vector.extract_strided_slice %0 {offsets = [1, 0], sizes = [1, 128], strides = [1, 1]} : vector<2x128xi32> to vector<1x128xi32>
    %8 = vector.broadcast %7 : vector<1x128xi32> to vector<32x128xi32>
    %9 = arith.cmpi eq, %1, %8 : vector<32x128xi32>
    %10 = arith.extui %9 : vector<32x128xi1> to vector<32x128xi32>
    %11 = arith.sitofp %10 : vector<32x128xi32> to vector<32x128xf32>
    %c0_1 = arith.constant 0 : index
    %c0_2 = arith.constant 0 : index
    %12 = vector.load %arg2[%c0_1, %c0_2] : memref<96x32xf32, #tpu.memory_space<vmem>>, vector<96x32xf32>
    %cst = arith.constant dense<0.000000e+00> : vector<96x128xf32>
    %13 = tpu.matmul %12, %6, %cst {dimension_numbers = #tpu.dot_dimension_numbers<[1], [0], [0], [1], [0, 0, 1, 1], [], []>} : vector<96x32xf32>, vector<32x128xf32>, vector<96x128xf32> -> vector<96x128xf32>
    %c0_3 = arith.constant 0 : index
    %c0_4 = arith.constant 0 : index
    %14 = vector.load %arg3[%c0_3, %c0_4] : memref<96x32xf32, #tpu.memory_space<vmem>>, vector<96x32xf32>
    %cst_5 = arith.constant dense<0.000000e+00> : vector<96x128xf32>
    %15 = tpu.matmul %14, %11, %cst_5 {dimension_numbers = #tpu.dot_dimension_numbers<[1], [0], [0], [1], [0, 0, 1, 1], [], []>} : vector<96x32xf32>, vector<32x128xf32>, vector<96x128xf32> -> vector<96x128xf32>
    %c0_6 = arith.constant 0 : index
    %c0_7 = arith.constant 0 : index
    %16 = vector.load %arg5[%c0_6, %c0_7] : memref<129x1xf32, #tpu.memory_space<vmem>>, vector<64x1xf32>
    %c64 = arith.constant 64 : index
    %c0_8 = arith.constant 0 : index
    %17 = vector.load %arg5[%c64, %c0_8] : memref<129x1xf32, #tpu.memory_space<vmem>>, vector<32x1xf32>
    %c96 = arith.constant 96 : index
    %c0_9 = arith.constant 0 : index
    %18 = vector.load %arg5[%c96, %c0_9] : memref<129x1xf32, #tpu.memory_space<vmem>>, vector<32x1xf32>
    %c128 = arith.constant 128 : index
    %c0_10 = arith.constant 0 : index
    %19 = vector.load %arg5[%c128, %c0_10] : memref<129x1xf32, #tpu.memory_space<vmem>>, vector<1x1xf32>
    %20 = vector.extract_strided_slice %13 {offsets = [32, 0], sizes = [64, 128], strides = [1, 1]} : vector<96x128xf32> to vector<64x128xf32>
    %21 = vector.extract_strided_slice %15 {offsets = [32, 0], sizes = [64, 128], strides = [1, 1]} : vector<96x128xf32> to vector<64x128xf32>
    %22 = arith.addf %20, %21 : vector<64x128xf32>
    %23 = vector.broadcast %16 : vector<64x1xf32> to vector<64x128xf32>
    %24 = arith.addf %22, %23 : vector<64x128xf32>
    %cst_11 = arith.constant 0.000000e+00 : f32
    %25 = vector.broadcast %cst_11 : f32 to vector<64x128xf32>
    %26 = arith.maximumf %24, %25 : vector<64x128xf32>
    %c0_12 = arith.constant 0 : index
    %c0_13 = arith.constant 0 : index
    %27 = vector.load %arg4[%c0_12, %c0_13] : memref<32x64xf32, #tpu.memory_space<vmem>>, vector<32x64xf32>
    %cst_14 = arith.constant dense<0.000000e+00> : vector<32x128xf32>
    %28 = tpu.matmul %27, %26, %cst_14 {dimension_numbers = #tpu.dot_dimension_numbers<[1], [0], [0], [1], [0, 0, 1, 1], [], []>} : vector<32x64xf32>, vector<64x128xf32>, vector<32x128xf32> -> vector<32x128xf32>
    %29 = vector.broadcast %17 : vector<32x1xf32> to vector<32x128xf32>
    %30 = arith.addf %28, %29 : vector<32x128xf32>
    %cst_15 = arith.constant 0.000000e+00 : f32
    %31 = vector.broadcast %cst_15 : f32 to vector<32x128xf32>
    %32 = arith.maximumf %30, %31 : vector<32x128xf32>
    %33 = vector.extract_strided_slice %13 {offsets = [0, 0], sizes = [32, 128], strides = [1, 1]} : vector<96x128xf32> to vector<32x128xf32>
    %34 = vector.extract_strided_slice %15 {offsets = [0, 0], sizes = [32, 128], strides = [1, 1]} : vector<96x128xf32> to vector<32x128xf32>
    %35 = arith.mulf %33, %34 : vector<32x128xf32>
    %cst_16 = arith.constant dense<0.000000e+00> : vector<128xf32>
    %36 = vector.multi_reduction <add>, %35, %cst_16 [0] : vector<32x128xf32> to vector<128xf32>
    %37 = vector.shape_cast %36 : vector<128xf32> to vector<1x128xf32>
    %38 = vector.broadcast %18 : vector<32x1xf32> to vector<32x128xf32>
    %39 = arith.mulf %38, %32 : vector<32x128xf32>
    %cst_17 = arith.constant dense<0.000000e+00> : vector<128xf32>
    %40 = vector.multi_reduction <add>, %39, %cst_17 [0] : vector<32x128xf32> to vector<128xf32>
    %41 = vector.shape_cast %40 : vector<128xf32> to vector<1x128xf32>
    %42 = arith.addf %37, %41 : vector<1x128xf32>
    %43 = vector.broadcast %19 : vector<1x1xf32> to vector<1x128xf32>
    %44 = arith.addf %42, %43 : vector<1x128xf32>
    %c0_18 = arith.constant 0 : index
    %c0_19 = arith.constant 0 : index
    %45 = vector.load %arg6[%c0_18, %c0_19] : memref<1x128xf32, #tpu.memory_space<vmem>>, vector<1x128xf32>
    tpu.vector_store %arg6[%c0_18, %c0_19], %44 {strides = array<i32>} : memref<1x128xf32, #tpu.memory_space<vmem>>, vector<1x128xf32>,
    return
  }
  func.func @transform_0(%arg0: i32) -> (i32, i32) {
    %c0_i32 = arith.constant 0 : i32
    %c0_i32_0 = arith.constant 0 : i32
    return %c0_i32, %arg0 : i32, i32
  }
  func.func @transform_1(%arg0: i32) -> (i32, i32) {
    %c0_i32 = arith.constant 0 : i32
    %c0_i32_0 = arith.constant 0 : i32
    %c0_i32_1 = arith.constant 0 : i32
    return %c0_i32, %c0_i32_0 : i32, i32
  }
  func.func @transform_2(%arg0: i32) -> (i32, i32) {
    %c0_i32 = arith.constant 0 : i32
    %c0_i32_0 = arith.constant 0 : i32
    %c0_i32_1 = arith.constant 0 : i32
    return %c0_i32, %c0_i32_0 : i32, i32
  }
  func.func @transform_3(%arg0: i32) -> (i32, i32) {
    %c0_i32 = arith.constant 0 : i32
    %c0_i32_0 = arith.constant 0 : i32
    %c0_i32_1 = arith.constant 0 : i32
    return %c0_i32, %c0_i32_0 : i32, i32
  }
  func.func @transform_4(%arg0: i32) -> (i32, i32) {
    %c0_i32 = arith.constant 0 : i32
    %c0_i32_0 = arith.constant 0 : i32
    %c0_i32_1 = arith.constant 0 : i32
    return %c0_i32, %c0_i32_0 : i32, i32
  }
  func.func @transform_5(%arg0: i32) -> (i32, i32) {
    %c0_i32 = arith.constant 0 : i32
    %c0_i32_0 = arith.constant 0 : i32
    return %c0_i32, %arg0 : i32, i32
  }
}

</mosaic_0001>

<bundles_post_ra>
// kernel: ncf_forward.1
= control target key start
LH: loop header
LB: loop body
LE: loop exit
PB: predicated region body
PF: predicated region fallthrough
CT: control target
= control target key end

     0   :  { %10 = vsyncpa [#allocation3], 0  ;;  %s1584_s0 = inlined_call_operand.vmem [shape: s32[2,256], index: 0, kind: input, shape index: {}]   ;;  %s1585_s1 = inlined_call_operand.vmem [shape: f32[96,32], index: 1, kind: input, shape index: {}]   ;;  %s1586_s2 = inlined_call_operand.vmem [shape: f32[96,32], index: 2, kind: input, shape index: {}]   ;;  %s1587_s3 = inlined_call_operand.vmem [shape: f32[32,64], index: 3, kind: input, shape index: {}]   ;;  %s1588_s4 = inlined_call_operand.vmem [shape: f32[129,1], index: 4, kind: input, shape index: {}]   ;;  %s1589_s5 = inlined_call_operand.hbm [shape: f32[1,256], index: 5, kind: output, shape index: {}]  }
   0x1   :  { %12 = vsyncpa [#allocation3 + $0x1], 0  ;;  %s1287_s18 = smov 0   ;;  %s1289_s19 = smov 0  }
   0x2   :  { %s1291_s20 = smov 0   ;;  %s1293_s21 = smov 0  }
   0x3 LB: > { %s1308_s22 = sadd.s32 4294967295, %s1252_s21   ;;  %s933_s23 = sadd.s32 4294967294, %s1252_s21   ;;  %s1252_s21 = sphi %s1293_s21, %s1599_s21   ;;  %s1248_s20 = sphi %s1291_s20, %s1598_s20   ;;  %s1244_s19 = sphi %s1289_s19, %s1597_s19   ;;  %s1240_s18 = sphi %s1287_s18, %s1596_s18  }
   0x4   : > { %s1312_s24 = sadd.s32 1, %s1252_s21   ;;  %s135_s25 = sadd.s32 1, %s1248_s20 }
   0x5   : > { %s132_s26 = ssub.s32 %s1252_s21, %s1312_s24  ;;  %p145_p0 = scmp.ne.s32.totalorder %s1248_s20, %s1244_s19 }
   0x6   : > { %p133_p1 = scmp.eq.s32.totalorder %s132_s26, 0  ;;  %p146_p2 = scmp.eq.s32.totalorder %s1308_s22, 1 }
   0x7   : > { %p151_p3 = scmp.ne.s32.totalorder %s1244_s19, %s1240_s18  ;;  %p152_p4 = scmp.eq.s32.totalorder %s933_s23, 1 }
   0x8   : > { %s1323_s27 = scalar_select %p133_p1, %s1248_s20, %s135_s25  }
   0x9   : > { %p1325_p5 = por %p146_p2, %p145_p0  ;;  %p1329_p6 = por %p152_p4, %p151_p3 }
   0xa   : > { %p936_p7 = scmp.ge.s32.totalorder %s1252_s21, 1  ;;  %p189_p8 = scmp.lt.s32.totalorder %s1252_s21, 3 }
   0xc   : > { %p190_p9 = pnand %p936_p7, %p189_p8 }
   0xd   : > { %p215_p10 = scmp.lt.s32.totalorder (!%p190_p9), %s1308_s22, 1  ;;  %v220_v0 = vlaneseq (!%p190_p9)  ;;  %v257_v1 = vld [vmem:[%s1585_s1] sm:$0xff] (!%p190_p9)  ;;  %vm269_vm0 = vcmask (!%p190_p9), 261120   ;;  %v433_v2 = vld [vmem:[%s1586_s2 + $0x10] sm:$0xff] (!%p190_p9)  ;;  %v1254_v4 = vmov (!%p190_p9), 0   ;;  %v605_v17 = vld [vmem:[%s1588_s4 + $0x8] sm:$0xff] (!%p190_p9) }
   0xe   : > { %193 = sbr.rel (%p190_p9) target bundleno = 540 (0x21c), region = 40  ;;  %1037 = vmatprep.mubr.msk.f32.mxu0 (!%p190_p9), %vm269_vm0, %v257_v1  ;;  %1066 = vmatprep.mubr.msk.f32.mxu1 (!%p190_p9), %vm269_vm0, %v433_v2  ;;  %v604_v13 = vld [vmem:[%s1588_s4] sm:$0xff] (!%p190_p9)  ;;  %v606_v14 = vld [vmem:[%s1588_s4 + $0x10] sm:$0xff] (!%p190_p9)  ;;  %v1255_v15 = vmov (!%p190_p9), 1.0|1.0   ;;  %v607_v18 = vld [vmem:[%s1588_s4 + $0x18] sm:$0xff] (!%p190_p9) }
   0xf   : > { %v221_v3 = vshrl.u32 (!%p190_p9), %v220_v0, 7  ;;  %1188 = vset.pattern.permute.xlu0 (!%p190_p9), %v1254_v4  ;;  %1189 = vset.pattern.permute.xlu1 (!%p190_p9), %v1254_v4  ;;  %v608_v20 = vld [vmem:[%s1588_s4 + $0x20] sm:$0xff] (!%p190_p9)  ;;  %v258_v21 = vld [vmem:[%s1585_s1 + $0x8] sm:$0xff] (!%p190_p9)  ;;  %v259_v23 = vld [vmem:[%s1585_s1 + $0x10] sm:$0xff] (!%p190_p9)  ;;  %vm709_vm13 = vcmask (!%p190_p9), 523264   ;;  %s213_s26 = sand.u32 (!%p190_p9), 1, %s1244_s19  }
  0x10   : > { %631 = vperm.xlu0 (!%p190_p9), %1188, %v604_v13   ;;  %641 = vperm.xlu1 (!%p190_p9), %1189, %v606_v14   ;;  %v609_v22 = vld [vmem:[%s1588_s4 + $0x28] sm:$0xff] (!%p190_p9)  ;;  %v434_v24 = vld [vmem:[%s1586_s2 + $0x18] sm:$0xff] (!%p190_p9)  ;;  %v435_v25 = vld [vmem:[%s1586_s2 + $0x20] sm:$0xff] (!%p190_p9)  ;;  %s982_s30 = sshll.u32 (!%p190_p9), %s1308_s22, 4  ;;  %s214_s6 = scalar_lea.vmem (!%p190_p9), [#allocation2], %s213_s26 }
  0x11   : > { %v227_v5 = vsub.s32 (!%p190_p9), 0, %v221_v3  ;;  %v243_v6 = vsub.s32 (!%p190_p9), 1, %v221_v3  ;;  %v222_v7 = vadd.s32 (!%p190_p9), 8, %v221_v3  ;;  %v223_v9 = vadd.s32 (!%p190_p9), 16, %v221_v3  ;;  %v610_v26 = vld [vmem:[%s1588_s4 + $0x30] sm:$0xff] (!%p190_p9)  ;;  %v260_v27 = vld [vmem:[%s1585_s1 + $0x18] sm:$0xff] (!%p190_p9) }
  0x12   : > { %v224_v10 = vadd.s32 (!%p190_p9), 24, %v221_v3  ;;  %v611_v28 = vld [vmem:[%s1588_s4 + $0x38] sm:$0xff] (!%p190_p9)  ;;  %v261_v29 = vld [vmem:[%s1585_s1 + $0x20] sm:$0xff] (!%p190_p9)  ;;  %v436_v30 = vld [vmem:[%s1586_s2 + $0x28] sm:$0xff] (!%p190_p9)  ;;  %s878_s7 = sshll.u32 (!%p190_p9), %s214_s6, 4  ;;  %s866_s11 = scalar_lea.sflag (!%p190_p9), [#allocation3], %s213_s26  ;;  %s1544_s7 = int_to_ptr.vmem [resolvable:$true] %s878_s7 }
  0x13   : > { %v437_v31 = vld [vmem:[%s1586_s2 + $0x30] sm:$0xff] (!%p190_p9)  ;;  %v612_v32 = vld [vmem:[%s1588_s4 + $0x40] sm:$0xff] (!%p190_p9)  ;;  %v262_v33 = vld [vmem:[%s1585_s1 + $0x28] sm:$0xff] (!%p190_p9)  ;;  %s1190_s12 = scalar_lea.vmem (!%p190_p9), %s1544_s7, 16 }
  0x14   : > { %636 = vperm.xlu0 (!%p190_p9), %1188, %v605_v17   ;;  %646 = vperm.xlu1 (!%p190_p9), %1189, %v607_v18   ;;  %v613_v34 = vld [vmem:[%s1588_s4 + $0x48] sm:$0xff] (!%p190_p9)  ;;  %v263_v35 = vld [vmem:[%s1585_s1 + $0x30] sm:$0xff] (!%p190_p9)  ;;  %v438_v36 = vld [vmem:[%s1586_s2 + $0x38] sm:$0xff] (!%p190_p9)  ;;  %p1191_p11 = scmp.ne.s32.totalorder (!%p190_p9), %s1544_s7, %s1190_s12 }
  0x15   : > { %s216_s9 = scalar_select %p215_p10, %s1308_s22, 1  ;;  %v439_v37 = vld [vmem:[%s1586_s2 + $0x40] sm:$0xff]  ;;  %v614_v38 = vld [vmem:[%s1588_s4 + $0x50] sm:$0xff]  ;;  %v264_v39 = vld [vmem:[%s1585_s1 + $0x38] sm:$0xff] }
  0x16   : > { %v615_v40 = vld [vmem:[%s1588_s4 + $0x58] sm:$0xff]  ;;  %v265_v41 = vld [vmem:[%s1585_s1 + $0x40] sm:$0xff]  ;;  %v440_v42 = vld [vmem:[%s1586_s2 + $0x48] sm:$0xff]  ;;  %p1192_p12 = pnand %p1191_p11, %p1325_p5  ;;  %s1256_s22 = smov [#allocation2]  }
  0x17   : > { %s937_s10 = sshll.u32 %s216_s9, 1  ;;  %v441_v43 = vld [vmem:[%s1586_s2 + $0x50] sm:$0xff]  ;;  %v616_v44 = vld [vmem:[%s1588_s4 + $0x60] sm:$0xff]  ;;  %v266_v45 = vld [vmem:[%s1585_s1 + $0x48] sm:$0xff] }
  0x18   : > { %s218_s13 = scalar_lea.vmem %s1584_s0, %s937_s10  ;;  %651 = vperm.xlu0 %1188, %v608_v20   ;;  %656 = vperm.xlu1 %1189, %v609_v22   ;;  %v617_v46 = vld [vmem:[%s1588_s4 + $0x68] sm:$0xff]  ;;  %v267_v47 = vld [vmem:[%s1585_s1 + $0x50] sm:$0xff]  ;;  %v442_v48 = vld [vmem:[%s1586_s2 + $0x58] sm:$0xff]  ;;  %s1542_s10 = scalar_lea.hbm %s1589_s5, %s982_s30 }
  0x19   : > { %v219_v8 = vld [vmem:[%s218_s13] sm:$0x3]  ;;  %v618_v49 = vld [vmem:[%s1588_s4 + $0x70] sm:$0xff]  ;;  %v268_v50 = vld [vmem:[%s1585_s1 + $0x58] sm:$0xff]  ;;  %p1193_p13 = pneg %p1192_p12  ;;  %s1194_s13 = sshll.u32 %s1256_s22, 4  ;;  %s1195_s13 = int_to_ptr.vmem [resolvable:$false] %s1194_s13 }
  0x1a   : > { %v228_v11 = vrot.slane %v219_v8, %v227_v5  ;;  %v244_v12 = vrot.slane %v219_v8, %v243_v6  ;;  %v619_v51 = vld [vmem:[%s1588_s4 + $0x78] sm:$0xff]  ;;  %v431_v52 = vld [vmem:[%s1586_s2] sm:$0xff]  ;;  %v432_v54 = vld [vmem:[%s1586_s2 + $0x8] sm:$0xff]  ;;  %s1196_s14 = scalar_lea.vmem %s1195_s13, 32  ;;  %p1197_p0 = scmp.lt.s32.totalorder %s1544_s7, %s1195_s13 }
  0x1b   : > { %v620_v53 = vld [vmem:[%s1588_s4 + $0x80] sm:$0x1]  ;;  %p1198_p1 = scmp.lt.s32.totalorder %s1196_s14, %s1190_s12 }
  0x1c   : > { %vm229_vm1 = vcmp.eq.s32.totalorder %v221_v3, %v228_v11  ;;  %vm230_vm2 = vcmp.eq.s32.totalorder %v222_v7, %v228_v11  ;;  %vm245_vm3 = vcmp.eq.s32.totalorder %v221_v3, %v244_v12  ;;  %vm246_vm4 = vcmp.eq.s32.totalorder %v222_v7, %v244_v12  ;;  %661 = vperm.xlu0 %1188, %v610_v26   ;;  %v685_v55 = vld [vmem:[%s1587_s3] sm:$0xff] }
  0x1d   : > { %vm1103_vm5 = vmpackc.low %vm230_vm2, %vm229_vm1  ;;  %vm231_vm6 = vcmp.eq.s32.totalorder %v223_v9, %v228_v11  ;;  %vm232_vm7 = vcmp.eq.s32.totalorder %v224_v10, %v228_v11  ;;  %vm247_vm8 = vcmp.eq.s32.totalorder %v223_v9, %v244_v12  ;;  %vm248_vm9 = vcmp.eq.s32.totalorder %v224_v10, %v244_v12  ;;  %666 = vperm.xlu1 %1189, %v611_v28   ;;  %p1199_p2 = por %p1198_p1, %p1197_p0 }
  0x1e   : > { %1104 = vmatprep.subr.msk.bf16.mxu0 %vm1103_vm5, %v1255_v15  ;;  %vm1354_vm10 = vmpackc.low %vm246_vm4, %vm245_vm3 }
  0x1f   : > { %1106 = vmatpush3.bf16.msk.msra.mxu0 %vm1103_vm5, %v1255_v15  ;;  %1135 = vmatprep.subr.msk.bf16.mxu1 %vm1354_vm10, %v1255_v15  ;;  %vm1107_vm11 = vmpackc.low %vm232_vm7, %vm231_vm6  ;;  %p1200_p3 = pnand %p1199_p2, %p1193_p13 }
  0x20   : > { %1108 = vmatprep.subr.msk.bf16.mxu0 %vm1107_vm11, %v1255_v15  ;;  %1137 = vmatpush3.bf16.msk.msra.mxu1 %vm1354_vm10, %v1255_v15  ;;  %vm1369_vm12 = vmpackc.low %vm248_vm9, %vm247_vm8 }
  0x21   : > { %1136 = vmatprep.subr.msk.bf16.mxu1 %vm1369_vm12, %v1255_v15  ;;  %691 = vperm.xlu0 %1188, %v612_v32  }
  0x22   : > { %696 = vperm.xlu1 %1189, %v613_v34  }
  0x23   : > { %1110 = vmatpush3.bf16.msk.msra.mxu0 %vm1107_vm11, %v1255_v15 }
  0x24   : > { %1138 = vmatpush3.bf16.msk.msra.mxu1 %vm1369_vm12, %v1255_v15  ;;  %1112 = vmatprep.subr.msk.bf16.mxu0 %vm1354_vm10, %v1255_v15 }
  0x25   : > { %701 = vperm.xlu0 %1188, %v614_v38  }
  0x26   : > { %1038 = vmatmul.mubr.msk.f32.vlgmr.msra.gmra.mrb[0].mxu0 %vm269_vm0, %v258_v21  ;;  %706 = vperm.xlu1 %1189, %v615_v40  }
  0x27   : > { %1040 = vmatprep.mubr.msk.f32.mxu0 %vm269_vm0, %v259_v23  ;;  %1067 = vmatmul.mubr.msk.f32.vlgmr.msra.gmra.mrb[0].mxu1 %vm269_vm0, %v434_v24 }
  0x28   : > { %1069 = vmatprep.mubr.msk.f32.mxu1 %vm269_vm0, %v435_v25  ;;  %1114 = vmatpush3.bf16.msk.msra.mxu0 %vm1354_vm10, %v1255_v15 }
  0x29   : > { %1116 = vmatprep.subr.msk.bf16.mxu0 %vm1369_vm12, %v1255_v15  ;;  %826 = vperm.xlu0 %1188, %v616_v44  }
  0x2a   : > { %1041 = vmatmul.mubr.msk.f32.gmra.mrb[2].mxu0 %vm269_vm0, %v260_v27  ;;  %831 = vperm.xlu1 %1189, %v617_v46  }
  0x2b   : > { %1043 = vmatprep.mubr.msk.f32.mxu0 %vm269_vm0, %v261_v29  ;;  %1070 = vmatmul.mubr.msk.f32.gmra.mrb[2].mxu1 %vm269_vm0, %v436_v30 }
  0x2c   : > { %1072 = vmatprep.mubr.msk.f32.mxu1 %vm269_vm0, %v437_v31  ;;  %1118 = vmatpush3.bf16.msk.msra.mxu0 %vm1369_vm12, %v1255_v15 }
  0x2d   : > { %836 = vperm.xlu0 %1188, %v618_v49  }
  0x2e   : > { %1044 = vmatmul.mubr.msk.f32.gmra.mrb[4].mxu0 %vm269_vm0, %v262_v33  ;;  %841 = vperm.xlu1 %1189, %v619_v51  }
  0x2f   : > { %1046 = vmatprep.mubr.msk.f32.mxu0 %vm269_vm0, %v263_v35  ;;  %1073 = vmatmul.mubr.msk.f32.gmra.mrb[4].mxu1 %vm269_vm0, %v438_v36 }
  0x30   : > { %1075 = vmatprep.mubr.msk.f32.mxu1 %vm269_vm0, %v439_v37 }
  0x31   : > { %860 = vperm.xlu0 %1188, %v620_v53  }
  0x32   : > { %1047 = vmatmul.mubr.msk.f32.gmra.mrb[6].mxu0 %vm269_vm0, %v264_v39 }
  0x33   : > { %1049 = vmatprep.mubr.msk.f32.mxu0 %vm269_vm0, %v265_v41  ;;  %1076 = vmatmul.mubr.msk.f32.gmra.mrb[6].mxu1 %vm269_vm0, %v440_v42 }
  0x34   : > { %1078 = vmatprep.mubr.msk.f32.mxu1 %vm269_vm0, %v441_v43 }
  0x36   : > { %1050 = vmatmul.mubr.msk.f32.gmra.mrb[8].mxu0 %vm269_vm0, %v266_v45 }
  0x37   : > { %1052 = vmatprep.mubr.msk.f32.mxu0 %vm269_vm0, %v267_v47  ;;  %1079 = vmatmul.mubr.msk.f32.gmra.mrb[8].mxu1 %vm269_vm0, %v442_v48 }
  0x38   : > { %1097 = vmatprep.mubr.msk.f32.mxu1 %vm709_vm13, %v685_v55 }
  0x3a   : > { %1053 = vmatmul.mubr.msk.f32.gmra.mrb[10].mxu0 %vm269_vm0, %v268_v50 }
  0x3b   : > { %1063 = vmatprep.mubr.msk.f32.mxu0 %vm269_vm0, %v431_v52 }
  0x3e   : > { %1064 = vmatmul.mubr.msk.f32.vlgmr.msra.gmra.mrb[12].mxu0 %vm269_vm0, %v432_v54 }
  0x8f   : > { %v632_v59 = vpop.permute.xlu0 %631  ;;  %v642_v61 = vpop.permute.xlu1 %641 }
  0x93   : > { %v637_v4 = vpop.permute.xlu0 %636  ;;  %v647_v9 = vpop.permute.xlu1 %646 }
  0x97   : > { %v652_v22 = vpop.permute.xlu0 %651  ;;  %v657_v24 = vpop.permute.xlu1 %656 }
  0x9b   : > { %v662_v45 = vpop.permute.xlu0 %661 }
  0x9c   : > { %v667_v42 = vpop.permute.xlu1 %666 }
  0xf9   : > { %v1516_v56 = vpop.f32.mrb[0].mxu0 }
  0xfa   : > { %v1518_v57 = vpop.f32.mrb[1].mxu0  ;;  %v1068_v58 = vpop.f32.mrb[0].mxu1 }
  0xfb   : > { %v555_v60 = vpop.f32.mrb[1].mxu1 }
  0xfd   : > { %v1042_v62 = vpop.f32.mrb[2].mxu0 }
  0xfe   : > { %v1520_v63 = vmul.f32 %v1068_v58, %v1042_v62  ;;  %v382_v0 = vpop.f32.mrb[3].mxu0  ;;  %v1071_v1 = vpop.f32.mrb[2].mxu1 }
  0xff   : > { %v813_v2 = vmul.f32 %v555_v60, %v382_v0  ;;  %v565_v3 = vpop.f32.mrb[3].mxu1  ;;  %v686_v60 = vld [vmem:[%s1587_s3 + $0x8] sm:$0xff]  ;;  %v692_v62 = vpop.permute.xlu0 %691 }
 0x100   : > { %v697_v0 = vpop.permute.xlu1 %696 }
 0x101   : > { %v1045_v5 = vpop.f32.mrb[4].mxu0 }
 0x102   : > { %v622_v6 = vadd.f32 %v1071_v1, %v1045_v5  ;;  %v392_v7 = vpop.f32.mrb[5].mxu0  ;;  %v1074_v8 = vpop.f32.mrb[4].mxu1 }
 0x103   : > { %v621_v10 = vadd.f32 %v565_v3, %v392_v7  ;;  %v575_v11 = vpop.f32.mrb[5].mxu1  ;;  %v702_v1 = vpop.permute.xlu0 %701 }
 0x104   : > { %v670_v12 = vadd.f32 %v637_v4, %v622_v6 }
 0x105   : > { %v669_v13 = vadd.f32 %v632_v59, %v621_v10  ;;  %v1048_v14 = vpop.f32.mrb[6].mxu0 }
 0x106   : > { %v678_v15 = vmax.f32 %v670_v12, 0.0  ;;  %v624_v16 = vadd.f32 %v1074_v8, %v1048_v14  ;;  %v402_v17 = vpop.f32.mrb[7].mxu0  ;;  %v1077_v18 = vpop.f32.mrb[6].mxu1 }
 0x107   : > { %v677_v19 = vmax.f32 %v669_v13, 0.0  ;;  %v623_v20 = vadd.f32 %v575_v11, %v402_v17  ;;  %v585_v21 = vpop.f32.mrb[7].mxu1  ;;  %v827_v6 = vpop.permute.xlu0 %826 }
 0x108   : > { %v672_v23 = vadd.f32 %v647_v9, %v624_v16 }
 0x109   : > { %v671_v25 = vadd.f32 %v642_v61, %v623_v20  ;;  %v1051_v26 = vpop.f32.mrb[8].mxu0  ;;  %v1119_v27 = vpack.c.bf16 %v678_v15, %v677_v19 }
 0x10a   : > { %v680_v28 = vmax.f32 %v672_v23, 0.0  ;;  %v626_v29 = vadd.f32 %v1077_v18, %v1051_v26  ;;  %v412_v30 = vpop.f32.mrb[9].mxu0  ;;  %v1080_v31 = vpop.f32.mrb[8].mxu1 }
 0x10b   : > { %v679_v32 = vmax.f32 %v671_v25, 0.0  ;;  %v625_v33 = vadd.f32 %v585_v21, %v412_v30  ;;  %1120 = vmatprep.subr.bf16.mxu1 %v1119_v27  ;;  %v595_v34 = vpop.f32.mrb[9].mxu1  ;;  %v837_v20 = vpop.permute.xlu0 %836 }
 0x10c   : > { %v674_v35 = vadd.f32 %v657_v24, %v626_v29  ;;  %1122 = vmatpush3.bf16.msra.mxu1 %v1119_v27 }
 0x10d   : > { %v673_v36 = vadd.f32 %v652_v22, %v625_v33  ;;  %v1054_v37 = vpop.f32.mrb[10].mxu0  ;;  %v1123_v38 = vpack.c.bf16 %v680_v28, %v679_v32 }
 0x10e   : > { %v682_v39 = vmax.f32 %v674_v35, 0.0  ;;  %v628_v40 = vadd.f32 %v1080_v31, %v1054_v37  ;;  %v422_v41 = vpop.f32.mrb[11].mxu0 }
 0x10f   : > { %v681_v43 = vmax.f32 %v673_v36, 0.0  ;;  %v627_v44 = vadd.f32 %v595_v34, %v422_v41  ;;  %1124 = vmatprep.subr.bf16.mxu1 %v1123_v38 }
 0x110   : > { %v676_v46 = vadd.f32 %v667_v42, %v628_v40  ;;  %1126 = vmatpush3.bf16.msra.mxu1 %v1123_v38  ;;  %v861_v38 = vpop.permute.xlu0 %860 }
 0x111   : > { %v675_v47 = vadd.f32 %v662_v45, %v627_v44  ;;  %v1065_v48 = vpop.f32.mrb[12].mxu0  ;;  %v1127_v49 = vpack.c.bf16 %v682_v39, %v681_v43 }
 0x112   : > { %v684_v50 = vmax.f32 %v676_v46, 0.0  ;;  %v812_v51 = vmul.f32 %v1065_v48, %v1516_v56  ;;  %v545_v52 = vpop.f32.mrb[13].mxu0  ;;  %v687_v56 = vld [vmem:[%s1587_s3 + $0x10] sm:$0xff] }
 0x113   : > { %v683_v53 = vmax.f32 %v675_v47, 0.0  ;;  %v811_v54 = vmul.f32 %v545_v52, %v1518_v57  ;;  %1128 = vmatprep.subr.bf16.mxu1 %v1127_v49  ;;  %v688_v57 = vld [vmem:[%s1587_s3 + $0x18] sm:$0xff] }
 0x114   : > { %1130 = vmatpush3.bf16.msra.mxu1 %v1127_v49 }
 0x115   : > { %v815_v55 = vadd.f32 %v812_v51, %v811_v54  ;;  %v1131_v58 = vpack.c.bf16 %v684_v50, %v683_v53 }
 0x117   : > { %v816_v59 = vadd.f32 %v815_v55, %v813_v2  ;;  %1132 = vmatprep.subr.bf16.mxu1 %v1131_v58  ;;  %v707_v2 = vpop.permute.xlu1 %706 }
 0x118   : > { %1134 = vmatpush3.bf16.msra.mxu1 %v1131_v58 }
 0x119   : > { %v817_v61 = vadd.f32 %v816_v59, %v1520_v63 }
 0x11b   : > { %1098 = vmatmul.mubr.msk.f32.vlgmr.msra.gmra.mrb[10].mxu1 %vm709_vm13, %v686_v60  ;;  %v832_v8 = vpop.permute.xlu1 %831  ;;  %v818_v14 = vrot.slane %v817_v61, 4 }
 0x11c   : > { %1100 = vmatprep.mubr.msk.f32.mxu1 %vm709_vm13, %v687_v56 }
 0x11d   : > { %v819_v21 = vadd.f32 %v818_v14, %v817_v61 }
 0x11f   : > { %1101 = vmatmul.mubr.msk.f32.gmra.mrb[12].mxu1 %vm709_vm13, %v688_v57  ;;  %v842_v23 = vpop.permute.xlu1 %841  ;;  %v820_v26 = vrot.slane %v819_v21, 2 }
 0x121   : > { %v821_v29 = vadd.f32 %v820_v26, %v819_v21 }
 0x123   : > { %v822_v33 = vrot.slane %v821_v29, 1 }
 0x125   : > { %v823_v35 = vadd.f32 %v822_v33, %v821_v29 }
 0x1ee   : > { %v1099_v3 = vpop.f32.mrb[10].mxu1 }
 0x1ef   : > { %v794_v63 = vadd.f32 %v1099_v3, %v697_v0  ;;  %v788_v4 = vpop.f32.mrb[11].mxu1 }
 0x1f0   : > { %v789_v5 = vadd.f32 %v788_v4, %v692_v62 }
 0x1f1   : > { %v808_v7 = vmax.f32 %v794_v63, 0.0 }
 0x1f2   : > { %v807_v9 = vmax.f32 %v789_v5, 0.0  ;;  %v1102_v10 = vpop.f32.mrb[12].mxu1 }
 0x1f3   : > { %v845_v11 = vmul.f32 %v832_v8, %v808_v7  ;;  %v804_v12 = vadd.f32 %v1102_v10, %v707_v2  ;;  %v798_v13 = vpop.f32.mrb[13].mxu1 }
 0x1f4   : > { %v844_v15 = vmul.f32 %v827_v6, %v807_v9  ;;  %v799_v16 = vadd.f32 %v798_v13, %v702_v1 }
 0x1f5   : > { %v810_v18 = vmax.f32 %v804_v12, 0.0 }
 0x1f6   : > { %v848_v17 = vadd.f32 %v845_v11, %v844_v15  ;;  %v809_v19 = vmax.f32 %v799_v16, 0.0 }
 0x1f7   : > { %v847_v24 = vmul.f32 %v842_v23, %v810_v18 }
 0x1f8   : > { %v846_v22 = vmul.f32 %v837_v20, %v809_v19 }
 0x1fa   : > { %v849_v25 = vadd.f32 %v848_v17, %v846_v22 }
 0x1fc   : > { %v850_v27 = vadd.f32 %v849_v25, %v847_v24 }
 0x1fe   : > { %v851_v28 = vrot.slane %v850_v27, 4 }
 0x200   : > { %v852_v30 = vadd.f32 %v851_v28, %v850_v27 }
 0x202   : > { %v853_v31 = vrot.slane %v852_v30, 2 }
 0x204   : > { %v854_v32 = vadd.f32 %v853_v31, %v852_v30 }
 0x206   : > { %v855_v34 = vrot.slane %v854_v32, 1 }
 0x208   : > { %v856_v36 = vadd.f32 %v855_v34, %v854_v32 }
 0x20a   : > { %v857_v37 = vadd.f32 %v856_v36, %v823_v35 }
 0x20c   : > { %v863_v39 = vadd.f32 %v861_v38, %v857_v37 }
 0x20e   : > { %864 = vst [vmem:[%s214_s6] sm:$0x1] %v863_v39 }
 0x20f   : > { %1203 = shalt.err (!%p1200_p3)
}
 0x210   : > { %s1204_s15 = scalar_lea.hbm %s1542_s10, 16  ;;  %s1208_s23 = scalar_lea.hbm %s1589_s5, 32 }
 0x211   : > { %p1205_p4 = scmp.ne.s32.totalorder %s1542_s10, %s1204_s15  ;;  %p1209_p9 = scmp.lt.u32.totalorder %s1542_s10, %s1589_s5 }
 0x212   : > { %p1210_p10 = scmp.lt.u32.totalorder %s1208_s23, %s1204_s15  ;;  %p1212_p12 = scmp.lt.u32.totalorder %s1204_s15, %s1542_s10 }
 0x213   : > { %p1206_p7 = pnand %p1205_p4, %p1325_p5 }
 0x214   : > { %p1211_p11 = por %p1210_p10, %p1209_p9 }
 0x215   : > { %p1207_p8 = pneg %p1206_p7 }
 0x216   : > { %p1213_p13 = por %p1212_p12, %p1211_p11 }
 0x218   : > { %p1214_p0 = pnand %p1213_p13, %p1207_p8 }
 0x21a   : > { %1217 = shalt.err (!%p1214_p0)
}
 0x21b   : > { %1147 = dma.vmem_to_hbm [thread:$0]  (%p1325_p5), %s1544_s7, 16, %s1542_s10, %s866_s11  }
 0x21c PF: > { %p1153_p1 = scmp.ge.s32.totalorder %s1252_s21, 2  ;;  %s890_s30 = sand.u32 1, %s1240_s18  }
 0x21d   : > { %s891_s6 = scalar_lea.sflag [#allocation3], %s890_s30 }
 0x21e   : > { %p1150_p2 = pnand %p1153_p1, %p1329_p6 }
 0x220   : > { %1235 = dma.done.wait (!%p1150_p2), %s891_s6, 16  }
 0x221   : > { %1237 = vsyncadd (!%p1150_p2), %s891_s6, 4294967280  ;;  %p15_p3 = scmp.ge.s32.totalorder %s1312_s24, 4   ;;  %s1596_s18 = smov %s1244_s19 }
 0x222   : > { %s1597_s19 = smov %s1248_s20  ;;  %s1598_s20 = smov %s1323_s27 }
 0x223   : > { %s1599_s21 = smov %s1312_s24  ;;  %17 = sbr.rel (!%p15_p3) target bundleno = 3 (0x3), region = 75 }
 0x22a   :  { %895 = vsyncpa [#allocation3], 1 }
 0x22b   :  { %897 = vsyncpa [#allocation3 + $0x1], 1 }

</bundles_post_ra>
